<compile_context>
chip_gen: v6e
topology: v6e:2x2x1
jax: 0.10.0
libtpu: 0.0.40
codegen_flags: <defaults>
</compile_context>

<pallas_src>
import jax
import jax.numpy as jnp
from jax import lax
from jax.experimental import pallas as pl
from jax.experimental.pallas import tpu as pltpu

DT = 0.2


def _round_up(a, b):
    return ((a + b - 1) // b) * b


def _rollout_kernel(start_ref, accel_ref, steer_ref, out_ref,
                    dpsi_sc, psi_sc, v_sc):
    # start_ref: (4, tileV)  rows = x, y, psi, v
    # accel_ref: (H, tileV)
    # steer_ref: (H, tileV)
    # out_ref  : (4, tileV)
    # dpsi_sc / psi_sc / v_sc : (H, tileV) f32 VMEM scratch
    num_horizon = accel_ref.shape[0]

    # Hoisted transcendental: tan over the whole (H, tileV) slab in one
    # vectorized pass (loop-invariant w.r.t. the recurrence).
    dpsi_sc[...] = jnp.tan(steer_ref[...]) * (0.5 * DT)

    x0 = start_ref[0:1, :]      # (1, tileV)
    y0 = start_ref[1:2, :]
    psi0 = start_ref[2:3, :]
    v0 = start_ref[3:4, :]

    # Serial recurrence: only adds/muls (VPU), no transcendentals on the
    # critical path. Records pre-update psi_j, v_j trajectories.
    def body(j, carry):
        psi, v = carry
        psi_sc[pl.ds(j, 1), :] = psi
        v_sc[pl.ds(j, 1), :] = v
        psi_next = psi + v * dpsi_sc[pl.ds(j, 1), :]
        v_next = 0.99 * v + accel_ref[pl.ds(j, 1), :] * DT
        return psi_next, v_next

    unroll = True if num_horizon <= 64 else 8
    psi_end, v_end = lax.fori_loop(0, num_horizon, body, (psi0, v0),
                                   unroll=unroll)

    # Vectorized trig over the full trajectory slab + H (sublane) reduction.
    psi_traj = psi_sc[...]                      # (H, tileV)
    v_traj = v_sc[...]                          # (H, tileV)
    x_end = x0 + DT * jnp.sum(v_traj * jnp.cos(psi_traj), axis=0,
                              keepdims=True)
    y_end = y0 + DT * jnp.sum(v_traj * jnp.sin(psi_traj), axis=0,
                              keepdims=True)

    out_ref[0:1, :] = x_end
    out_ref[1:2, :] = y_end
    out_ref[2:3, :] = psi_end
    out_ref[3:4, :] = v_end


def control_variable_forward(start_state, control_variables):
    """Pallas equivalent of ControlVariable.forward.

    start_state       : (num_vehicle, 4) float32
    control_variables : (num_horizon, num_vehicle, num_control_variable) float32
    returns end_state : (num_vehicle, 4) float32
    """
    num_vehicle = start_state.shape[0]
    assert start_state.shape == (num_vehicle, 4)
    num_horizon, nv2, num_ctrl = control_variables.shape
    assert nv2 == num_vehicle and num_ctrl >= 2

    # Lane-dense slabs: vehicles on the fast (lane) axis everywhere.
    accel = control_variables[:, :, 0].astype(jnp.float32)   # (H, V)
    steer = control_variables[:, :, 1].astype(jnp.float32)   # (H, V)
    start_t = jnp.transpose(start_state, (1, 0)).astype(jnp.float32)  # (4, V)

    # Pad V to a multiple of the lane tile (multiple of 128); zero padding is
    # benign (tan(0)=0, v=0) and padded lanes are sliced away afterwards.
    tile_v = min(512, _round_up(num_vehicle, 128))
    v_pad = _round_up(num_vehicle, tile_v)
    pad = v_pad - num_vehicle
    if pad:
        accel = jnp.pad(accel, ((0, 0), (0, pad)))
        steer = jnp.pad(steer, ((0, 0), (0, pad)))
        start_t = jnp.pad(start_t, ((0, 0), (0, pad)))

    grid = (v_pad // tile_v,)

    end_t = pl.pallas_call(
        _rollout_kernel,
        out_shape=jax.ShapeDtypeStruct((4, v_pad), jnp.float32),
        grid_spec=pltpu.PrefetchScalarGridSpec(
            num_scalar_prefetch=0,
            grid=grid,
            in_specs=[
                pl.BlockSpec((4, tile_v), lambda i: (0, i)),
                pl.BlockSpec((num_horizon, tile_v), lambda i: (0, i)),
                pl.BlockSpec((num_horizon, tile_v), lambda i: (0, i)),
            ],
            out_specs=pl.BlockSpec((4, tile_v), lambda i: (0, i)),
            scratch_shapes=[
                pltpu.VMEM((num_horizon, tile_v), jnp.float32),  # dt/2 * tan
                pltpu.VMEM((num_horizon, tile_v), jnp.float32),  # psi traj
                pltpu.VMEM((num_horizon, tile_v), jnp.float32),  # v traj
            ],
        ),
        compiler_params=pltpu.CompilerParams(
            dimension_semantics=("parallel",),
            vmem_limit_bytes=32 * 1024 * 1024,
        ),
    )(start_t, accel, steer)

    return jnp.transpose(end_t[:, :num_vehicle], (1, 0))  # (V, 4)


def _reference_forward(start_state, control_variables):
    """Pure-JAX reference matching the PyTorch loop semantics."""
    num_horizon = control_variables.shape[0]
    x = start_state[:, 0]
    y = start_state[:, 1]
    psi = start_state[:, 2]
    v = start_state[:, 3]
    for j in range(num_horizon):
        x = x + v * DT * jnp.cos(psi)
        y = y + v * DT * jnp.sin(psi)
        psi = psi + v * DT * jnp.tan(control_variables[j, :, 1]) / 2.0
        v = 0.99 * v + control_variables[j, :, 0] * DT
    return jnp.stack([x, y, psi, v], axis=1)


if __name__ == "__main__":
    num_vehicle = 4
    num_control_variable = 2
    num_horizon = 8

    key = jax.random.PRNGKey(0)
    k_state, k_ctrl = jax.random.split(key)

    # Deterministic synthetic inputs. The PyTorch module initializes
    # control_variables to zeros; small random values exercise tan/steering.
    start_state = jax.random.normal(k_state, (num_vehicle, 4), dtype=jnp.float32)
    control_variables = 0.1 * jax.random.normal(
        k_ctrl, (num_horizon, num_vehicle, num_control_variable),
        dtype=jnp.float32,
    )

    end_state = control_variable_forward(start_state, control_variables)
    end_state = jax.block_until_ready(end_state)

    ref = _reference_forward(start_state, control_variables)
    assert end_state.shape == (num_vehicle, 4)
    assert jnp.allclose(end_state, ref, atol=1e-4, rtol=1e-4), (end_state, ref)

    print("KERNEL_OK")
</pallas_src>

<mosaic_0001>
module attributes {stable_mosaic.version = 11 : i64} {
  func.func @_rollout_kernel(%arg0: i32, %arg1: memref<4x128xf32, #tpu.memory_space<vmem>>, %arg2: memref<8x128xf32, #tpu.memory_space<vmem>>, %arg3: memref<8x128xf32, #tpu.memory_space<vmem>>, %arg4: memref<4x128xf32, #tpu.memory_space<vmem>>, %arg5: memref<8x128xf32, #tpu.memory_space<vmem>>, %arg6: memref<8x128xf32, #tpu.memory_space<vmem>>, %arg7: memref<8x128xf32, #tpu.memory_space<vmem>>) attributes {dimension_semantics = [#tpu.dimension_semantics<parallel>], iteration_bounds = array<i64: 1>, scalar_prefetch = 0 : i64, scratch_operands = 3 : i64, tpu.core_type = #tpu.core_type<tc>, window_params = [{transform_indices = @transform_0, window_bounds = array<i64: 4, 128>}, {transform_indices = @transform_1, window_bounds = array<i64: 8, 128>}, {transform_indices = @transform_2, window_bounds = array<i64: 8, 128>}, {transform_indices = @transform_3, window_bounds = array<i64: 4, 128>}]} {
    %c0 = arith.constant 0 : index
    %c0_0 = arith.constant 0 : index
    %0 = vector.load %arg3[%c0, %c0_0] : memref<8x128xf32, #tpu.memory_space<vmem>>, vector<8x128xf32>
    %1 = math.tan %0 : vector<8x128xf32>
    %cst = arith.constant 1.000000e-01 : f32
    %2 = vector.broadcast %cst : f32 to vector<8x128xf32>
    %3 = arith.mulf %1, %2 : vector<8x128xf32>
    %c0_1 = arith.constant 0 : index
    %c0_2 = arith.constant 0 : index
    %4 = vector.load %arg5[%c0_1, %c0_2] : memref<8x128xf32, #tpu.memory_space<vmem>>, vector<8x128xf32>
    tpu.vector_store %arg5[%c0_1, %c0_2], %3 {strides = array<i32>} : memref<8x128xf32, #tpu.memory_space<vmem>>, vector<8x128xf32>,
    %c0_3 = arith.constant 0 : index
    %c0_4 = arith.constant 0 : index
    %5 = vector.load %arg1[%c0_3, %c0_4] : memref<4x128xf32, #tpu.memory_space<vmem>>, vector<1x128xf32>
    %c1 = arith.constant 1 : index
    %c0_5 = arith.constant 0 : index
    %6 = vector.load %arg1[%c1, %c0_5] : memref<4x128xf32, #tpu.memory_space<vmem>>, vector<1x128xf32>
    %c2 = arith.constant 2 : index
    %c0_6 = arith.constant 0 : index
    %7 = vector.load %arg1[%c2, %c0_6] : memref<4x128xf32, #tpu.memory_space<vmem>>, vector<1x128xf32>
    %c3 = arith.constant 3 : index
    %c0_7 = arith.constant 0 : index
    %8 = vector.load %arg1[%c3, %c0_7] : memref<4x128xf32, #tpu.memory_space<vmem>>, vector<1x128xf32>
    %c0_i32 = arith.constant 0 : i32
    %9 = arith.index_cast %c0_i32 : i32 to index
    %c0_8 = arith.constant 0 : index
    %10 = vector.load %arg6[%9, %c0_8] : memref<8x128xf32, #tpu.memory_space<vmem>>, vector<1x128xf32>
    tpu.vector_store %arg6[%9, %c0_8], %7 {strides = array<i32>} : memref<8x128xf32, #tpu.memory_space<vmem>>, vector<1x128xf32>,
    %11 = arith.index_cast %c0_i32 : i32 to index
    %c0_9 = arith.constant 0 : index
    %12 = vector.load %arg7[%11, %c0_9] : memref<8x128xf32, #tpu.memory_space<vmem>>, vector<1x128xf32>
    tpu.vector_store %arg7[%11, %c0_9], %8 {strides = array<i32>} : memref<8x128xf32, #tpu.memory_space<vmem>>, vector<1x128xf32>,
    %13 = arith.index_cast %c0_i32 : i32 to index
    %c0_10 = arith.constant 0 : index
    %14 = vector.load %arg5[%13, %c0_10] : memref<8x128xf32, #tpu.memory_space<vmem>>, vector<1x128xf32>
    %15 = arith.mulf %8, %14 : vector<1x128xf32>
    %16 = arith.addf %7, %15 : vector<1x128xf32>
    %cst_11 = arith.constant 9.900000e-01 : f32
    %17 = vector.broadcast %cst_11 : f32 to vector<1x128xf32>
    %18 = arith.mulf %17, %8 : vector<1x128xf32>
    %19 = arith.index_cast %c0_i32 : i32 to index
    %c0_12 = arith.constant 0 : index
    %20 = vector.load %arg2[%19, %c0_12] : memref<8x128xf32, #tpu.memory_space<vmem>>, vector<1x128xf32>
    %cst_13 = arith.constant 2.000000e-01 : f32
    %21 = vector.broadcast %cst_13 : f32 to vector<1x128xf32>
    %22 = arith.mulf %20, %21 : vector<1x128xf32>
    %23 = arith.addf %18, %22 : vector<1x128xf32>
    %c1_i32 = arith.constant 1 : i32
    %24 = arith.index_cast %c1_i32 : i32 to index
    %c0_14 = arith.constant 0 : index
    %25 = vector.load %arg6[%24, %c0_14] : memref<8x128xf32, #tpu.memory_space<vmem>>, vector<1x128xf32>
    tpu.vector_store %arg6[%24, %c0_14], %16 {strides = array<i32>} : memref<8x128xf32, #tpu.memory_space<vmem>>, vector<1x128xf32>,
    %26 = arith.index_cast %c1_i32 : i32 to index
    %c0_15 = arith.constant 0 : index
    %27 = vector.load %arg7[%26, %c0_15] : memref<8x128xf32, #tpu.memory_space<vmem>>, vector<1x128xf32>
    tpu.vector_store %arg7[%26, %c0_15], %23 {strides = array<i32>} : memref<8x128xf32, #tpu.memory_space<vmem>>, vector<1x128xf32>,
    %28 = arith.index_cast %c1_i32 : i32 to index
    %c0_16 = arith.constant 0 : index
    %29 = vector.load %arg5[%28, %c0_16] : memref<8x128xf32, #tpu.memory_space<vmem>>, vector<1x128xf32>
    %30 = arith.mulf %23, %29 : vector<1x128xf32>
    %31 = arith.addf %16, %30 : vector<1x128xf32>
    %cst_17 = arith.constant 9.900000e-01 : f32
    %32 = vector.broadcast %cst_17 : f32 to vector<1x128xf32>
    %33 = arith.mulf %32, %23 : vector<1x128xf32>
    %34 = arith.index_cast %c1_i32 : i32 to index
    %c0_18 = arith.constant 0 : index
    %35 = vector.load %arg2[%34, %c0_18] : memref<8x128xf32, #tpu.memory_space<vmem>>, vector<1x128xf32>
    %cst_19 = arith.constant 2.000000e-01 : f32
    %36 = vector.broadcast %cst_19 : f32 to vector<1x128xf32>
    %37 = arith.mulf %35, %36 : vector<1x128xf32>
    %38 = arith.addf %33, %37 : vector<1x128xf32>
    %c2_i32 = arith.constant 2 : i32
    %39 = arith.index_cast %c2_i32 : i32 to index
    %c0_20 = arith.constant 0 : index
    %40 = vector.load %arg6[%39, %c0_20] : memref<8x128xf32, #tpu.memory_space<vmem>>, vector<1x128xf32>
    tpu.vector_store %arg6[%39, %c0_20], %31 {strides = array<i32>} : memref<8x128xf32, #tpu.memory_space<vmem>>, vector<1x128xf32>,
    %41 = arith.index_cast %c2_i32 : i32 to index
    %c0_21 = arith.constant 0 : index
    %42 = vector.load %arg7[%41, %c0_21] : memref<8x128xf32, #tpu.memory_space<vmem>>, vector<1x128xf32>
    tpu.vector_store %arg7[%41, %c0_21], %38 {strides = array<i32>} : memref<8x128xf32, #tpu.memory_space<vmem>>, vector<1x128xf32>,
    %43 = arith.index_cast %c2_i32 : i32 to index
    %c0_22 = arith.constant 0 : index
    %44 = vector.load %arg5[%43, %c0_22] : memref<8x128xf32, #tpu.memory_space<vmem>>, vector<1x128xf32>
    %45 = arith.mulf %38, %44 : vector<1x128xf32>
    %46 = arith.addf %31, %45 : vector<1x128xf32>
    %cst_23 = arith.constant 9.900000e-01 : f32
    %47 = vector.broadcast %cst_23 : f32 to vector<1x128xf32>
    %48 = arith.mulf %47, %38 : vector<1x128xf32>
    %49 = arith.index_cast %c2_i32 : i32 to index
    %c0_24 = arith.constant 0 : index
    %50 = vector.load %arg2[%49, %c0_24] : memref<8x128xf32, #tpu.memory_space<vmem>>, vector<1x128xf32>
    %cst_25 = arith.constant 2.000000e-01 : f32
    %51 = vector.broadcast %cst_25 : f32 to vector<1x128xf32>
    %52 = arith.mulf %50, %51 : vector<1x128xf32>
    %53 = arith.addf %48, %52 : vector<1x128xf32>
    %c3_i32 = arith.constant 3 : i32
    %54 = arith.index_cast %c3_i32 : i32 to index
    %c0_26 = arith.constant 0 : index
    %55 = vector.load %arg6[%54, %c0_26] : memref<8x128xf32, #tpu.memory_space<vmem>>, vector<1x128xf32>
    tpu.vector_store %arg6[%54, %c0_26], %46 {strides = array<i32>} : memref<8x128xf32, #tpu.memory_space<vmem>>, vector<1x128xf32>,
    %56 = arith.index_cast %c3_i32 : i32 to index
    %c0_27 = arith.constant 0 : index
    %57 = vector.load %arg7[%56, %c0_27] : memref<8x128xf32, #tpu.memory_space<vmem>>, vector<1x128xf32>
    tpu.vector_store %arg7[%56, %c0_27], %53 {strides = array<i32>} : memref<8x128xf32, #tpu.memory_space<vmem>>, vector<1x128xf32>,
    %58 = arith.index_cast %c3_i32 : i32 to index
    %c0_28 = arith.constant 0 : index
    %59 = vector.load %arg5[%58, %c0_28] : memref<8x128xf32, #tpu.memory_space<vmem>>, vector<1x128xf32>
    %60 = arith.mulf %53, %59 : vector<1x128xf32>
    %61 = arith.addf %46, %60 : vector<1x128xf32>
    %cst_29 = arith.constant 9.900000e-01 : f32
    %62 = vector.broadcast %cst_29 : f32 to vector<1x128xf32>
    %63 = arith.mulf %62, %53 : vector<1x128xf32>
    %64 = arith.index_cast %c3_i32 : i32 to index
    %c0_30 = arith.constant 0 : index
    %65 = vector.load %arg2[%64, %c0_30] : memref<8x128xf32, #tpu.memory_space<vmem>>, vector<1x128xf32>
    %cst_31 = arith.constant 2.000000e-01 : f32
    %66 = vector.broadcast %cst_31 : f32 to vector<1x128xf32>
    %67 = arith.mulf %65, %66 : vector<1x128xf32>
    %68 = arith.addf %63, %67 : vector<1x128xf32>
    %c4_i32 = arith.constant 4 : i32
    %69 = arith.index_cast %c4_i32 : i32 to index
    %c0_32 = arith.constant 0 : index
    %70 = vector.load %arg6[%69, %c0_32] : memref<8x128xf32, #tpu.memory_space<vmem>>, vector<1x128xf32>
    tpu.vector_store %arg6[%69, %c0_32], %61 {strides = array<i32>} : memref<8x128xf32, #tpu.memory_space<vmem>>, vector<1x128xf32>,
    %71 = arith.index_cast %c4_i32 : i32 to index
    %c0_33 = arith.constant 0 : index
    %72 = vector.load %arg7[%71, %c0_33] : memref<8x128xf32, #tpu.memory_space<vmem>>, vector<1x128xf32>
    tpu.vector_store %arg7[%71, %c0_33], %68 {strides = array<i32>} : memref<8x128xf32, #tpu.memory_space<vmem>>, vector<1x128xf32>,
    %73 = arith.index_cast %c4_i32 : i32 to index
    %c0_34 = arith.constant 0 : index
    %74 = vector.load %arg5[%73, %c0_34] : memref<8x128xf32, #tpu.memory_space<vmem>>, vector<1x128xf32>
    %75 = arith.mulf %68, %74 : vector<1x128xf32>
    %76 = arith.addf %61, %75 : vector<1x128xf32>
    %cst_35 = arith.constant 9.900000e-01 : f32
    %77 = vector.broadcast %cst_35 : f32 to vector<1x128xf32>
    %78 = arith.mulf %77, %68 : vector<1x128xf32>
    %79 = arith.index_cast %c4_i32 : i32 to index
    %c0_36 = arith.constant 0 : index
    %80 = vector.load %arg2[%79, %c0_36] : memref<8x128xf32, #tpu.memory_space<vmem>>, vector<1x128xf32>
    %cst_37 = arith.constant 2.000000e-01 : f32
    %81 = vector.broadcast %cst_37 : f32 to vector<1x128xf32>
    %82 = arith.mulf %80, %81 : vector<1x128xf32>
    %83 = arith.addf %78, %82 : vector<1x128xf32>
    %c5_i32 = arith.constant 5 : i32
    %84 = arith.index_cast %c5_i32 : i32 to index
    %c0_38 = arith.constant 0 : index
    %85 = vector.load %arg6[%84, %c0_38] : memref<8x128xf32, #tpu.memory_space<vmem>>, vector<1x128xf32>
    tpu.vector_store %arg6[%84, %c0_38], %76 {strides = array<i32>} : memref<8x128xf32, #tpu.memory_space<vmem>>, vector<1x128xf32>,
    %86 = arith.index_cast %c5_i32 : i32 to index
    %c0_39 = arith.constant 0 : index
    %87 = vector.load %arg7[%86, %c0_39] : memref<8x128xf32, #tpu.memory_space<vmem>>, vector<1x128xf32>
    tpu.vector_store %arg7[%86, %c0_39], %83 {strides = array<i32>} : memref<8x128xf32, #tpu.memory_space<vmem>>, vector<1x128xf32>,
    %88 = arith.index_cast %c5_i32 : i32 to index
    %c0_40 = arith.constant 0 : index
    %89 = vector.load %arg5[%88, %c0_40] : memref<8x128xf32, #tpu.memory_space<vmem>>, vector<1x128xf32>
    %90 = arith.mulf %83, %89 : vector<1x128xf32>
    %91 = arith.addf %76, %90 : vector<1x128xf32>
    %cst_41 = arith.constant 9.900000e-01 : f32
    %92 = vector.broadcast %cst_41 : f32 to vector<1x128xf32>
    %93 = arith.mulf %92, %83 : vector<1x128xf32>
    %94 = arith.index_cast %c5_i32 : i32 to index
    %c0_42 = arith.constant 0 : index
    %95 = vector.load %arg2[%94, %c0_42] : memref<8x128xf32, #tpu.memory_space<vmem>>, vector<1x128xf32>
    %cst_43 = arith.constant 2.000000e-01 : f32
    %96 = vector.broadcast %cst_43 : f32 to vector<1x128xf32>
    %97 = arith.mulf %95, %96 : vector<1x128xf32>
    %98 = arith.addf %93, %97 : vector<1x128xf32>
    %c6_i32 = arith.constant 6 : i32
    %99 = arith.index_cast %c6_i32 : i32 to index
    %c0_44 = arith.constant 0 : index
    %100 = vector.load %arg6[%99, %c0_44] : memref<8x128xf32, #tpu.memory_space<vmem>>, vector<1x128xf32>
    tpu.vector_store %arg6[%99, %c0_44], %91 {strides = array<i32>} : memref<8x128xf32, #tpu.memory_space<vmem>>, vector<1x128xf32>,
    %101 = arith.index_cast %c6_i32 : i32 to index
    %c0_45 = arith.constant 0 : index
    %102 = vector.load %arg7[%101, %c0_45] : memref<8x128xf32, #tpu.memory_space<vmem>>, vector<1x128xf32>
    tpu.vector_store %arg7[%101, %c0_45], %98 {strides = array<i32>} : memref<8x128xf32, #tpu.memory_space<vmem>>, vector<1x128xf32>,
    %103 = arith.index_cast %c6_i32 : i32 to index
    %c0_46 = arith.constant 0 : index
    %104 = vector.load %arg5[%103, %c0_46] : memref<8x128xf32, #tpu.memory_space<vmem>>, vector<1x128xf32>
    %105 = arith.mulf %98, %104 : vector<1x128xf32>
    %106 = arith.addf %91, %105 : vector<1x128xf32>
    %cst_47 = arith.constant 9.900000e-01 : f32
    %107 = vector.broadcast %cst_47 : f32 to vector<1x128xf32>
    %108 = arith.mulf %107, %98 : vector<1x128xf32>
    %109 = arith.index_cast %c6_i32 : i32 to index
    %c0_48 = arith.constant 0 : index
    %110 = vector.load %arg2[%109, %c0_48] : memref<8x128xf32, #tpu.memory_space<vmem>>, vector<1x128xf32>
    %cst_49 = arith.constant 2.000000e-01 : f32
    %111 = vector.broadcast %cst_49 : f32 to vector<1x128xf32>
    %112 = arith.mulf %110, %111 : vector<1x128xf32>
    %113 = arith.addf %108, %112 : vector<1x128xf32>
    %c7_i32 = arith.constant 7 : i32
    %114 = arith.index_cast %c7_i32 : i32 to index
    %c0_50 = arith.constant 0 : index
    %115 = vector.load %arg6[%114, %c0_50] : memref<8x128xf32, #tpu.memory_space<vmem>>, vector<1x128xf32>
    tpu.vector_store %arg6[%114, %c0_50], %106 {strides = array<i32>} : memref<8x128xf32, #tpu.memory_space<vmem>>, vector<1x128xf32>,
    %116 = arith.index_cast %c7_i32 : i32 to index
    %c0_51 = arith.constant 0 : index
    %117 = vector.load %arg7[%116, %c0_51] : memref<8x128xf32, #tpu.memory_space<vmem>>, vector<1x128xf32>
    tpu.vector_store %arg7[%116, %c0_51], %113 {strides = array<i32>} : memref<8x128xf32, #tpu.memory_space<vmem>>, vector<1x128xf32>,
    %118 = arith.index_cast %c7_i32 : i32 to index
    %c0_52 = arith.constant 0 : index
    %119 = vector.load %arg5[%118, %c0_52] : memref<8x128xf32, #tpu.memory_space<vmem>>, vector<1x128xf32>
    %120 = arith.mulf %113, %119 : vector<1x128xf32>
    %121 = arith.addf %106, %120 : vector<1x128xf32>
    %cst_53 = arith.constant 9.900000e-01 : f32
    %122 = vector.broadcast %cst_53 : f32 to vector<1x128xf32>
    %123 = arith.mulf %122, %113 : vector<1x128xf32>
    %124 = arith.index_cast %c7_i32 : i32 to index
    %c0_54 = arith.constant 0 : index
    %125 = vector.load %arg2[%124, %c0_54] : memref<8x128xf32, #tpu.memory_space<vmem>>, vector<1x128xf32>
    %cst_55 = arith.constant 2.000000e-01 : f32
    %126 = vector.broadcast %cst_55 : f32 to vector<1x128xf32>
    %127 = arith.mulf %125, %126 : vector<1x128xf32>
    %128 = arith.addf %123, %127 : vector<1x128xf32>
    %c8_i32 = arith.constant 8 : i32
    %c0_56 = arith.constant 0 : index
    %c0_57 = arith.constant 0 : index
    %129 = vector.load %arg6[%c0_56, %c0_57] : memref<8x128xf32, #tpu.memory_space<vmem>>, vector<8x128xf32>
    %c0_58 = arith.constant 0 : index
    %c0_59 = arith.constant 0 : index
    %130 = vector.load %arg7[%c0_58, %c0_59] : memref<8x128xf32, #tpu.memory_space<vmem>>, vector<8x128xf32>
    %131 = math.cos %129 : vector<8x128xf32>
    %132 = arith.mulf %130, %131 : vector<8x128xf32>
    %cst_60 = arith.constant dense<0.000000e+00> : vector<128xf32>
    %133 = vector.multi_reduction <add>, %132, %cst_60 [0] : vector<8x128xf32> to vector<128xf32>
    %134 = vector.shape_cast %133 : vector<128xf32> to vector<1x128xf32>
    %cst_61 = arith.constant 2.000000e-01 : f32
    %135 = vector.broadcast %cst_61 : f32 to vector<1x128xf32>
    %136 = arith.mulf %135, %134 : vector<1x128xf32>
    %137 = arith.addf %5, %136 : vector<1x128xf32>
    %138 = math.sin %129 : vector<8x128xf32>
    %139 = arith.mulf %130, %138 : vector<8x128xf32>
    %cst_62 = arith.constant dense<0.000000e+00> : vector<128xf32>
    %140 = vector.multi_reduction <add>, %139, %cst_62 [0] : vector<8x128xf32> to vector<128xf32>
    %141 = vector.shape_cast %140 : vector<128xf32> to vector<1x128xf32>
    %cst_63 = arith.constant 2.000000e-01 : f32
    %142 = vector.broadcast %cst_63 : f32 to vector<1x128xf32>
    %143 = arith.mulf %142, %141 : vector<1x128xf32>
    %144 = arith.addf %6, %143 : vector<1x128xf32>
    %c0_64 = arith.constant 0 : index
    %c0_65 = arith.constant 0 : index
    %145 = vector.load %arg4[%c0_64, %c0_65] : memref<4x128xf32, #tpu.memory_space<vmem>>, vector<1x128xf32>
    tpu.vector_store %arg4[%c0_64, %c0_65], %137 {strides = array<i32>} : memref<4x128xf32, #tpu.memory_space<vmem>>, vector<1x128xf32>,
    %c1_66 = arith.constant 1 : index
    %c0_67 = arith.constant 0 : index
    %146 = vector.load %arg4[%c1_66, %c0_67] : memref<4x128xf32, #tpu.memory_space<vmem>>, vector<1x128xf32>
    tpu.vector_store %arg4[%c1_66, %c0_67], %144 {strides = array<i32>} : memref<4x128xf32, #tpu.memory_space<vmem>>, vector<1x128xf32>,
    %c2_68 = arith.constant 2 : index
    %c0_69 = arith.constant 0 : index
    %147 = vector.load %arg4[%c2_68, %c0_69] : memref<4x128xf32, #tpu.memory_space<vmem>>, vector<1x128xf32>
    tpu.vector_store %arg4[%c2_68, %c0_69], %121 {strides = array<i32>} : memref<4x128xf32, #tpu.memory_space<vmem>>, vector<1x128xf32>,
    %c3_70 = arith.constant 3 : index
    %c0_71 = arith.constant 0 : index
    %148 = vector.load %arg4[%c3_70, %c0_71] : memref<4x128xf32, #tpu.memory_space<vmem>>, vector<1x128xf32>
    tpu.vector_store %arg4[%c3_70, %c0_71], %128 {strides = array<i32>} : memref<4x128xf32, #tpu.memory_space<vmem>>, vector<1x128xf32>,
    return
  }
  func.func @transform_0(%arg0: i32) -> (i32, i32) {
    %c0_i32 = arith.constant 0 : i32
    %c0_i32_0 = arith.constant 0 : i32
    return %c0_i32, %arg0 : i32, i32
  }
  func.func @transform_1(%arg0: i32) -> (i32, i32) {
    %c0_i32 = arith.constant 0 : i32
    %c0_i32_0 = arith.constant 0 : i32
    return %c0_i32, %arg0 : i32, i32
  }
  func.func @transform_2(%arg0: i32) -> (i32, i32) {
    %c0_i32 = arith.constant 0 : i32
    %c0_i32_0 = arith.constant 0 : i32
    return %c0_i32, %arg0 : i32, i32
  }
  func.func @transform_3(%arg0: i32) -> (i32, i32) {
    %c0_i32 = arith.constant 0 : i32
    %c0_i32_0 = arith.constant 0 : i32
    return %c0_i32, %arg0 : i32, i32
  }
}

</mosaic_0001>

<bundles_post_ra>
// kernel: tpu_custom_call.1
= control target key start
LH: loop header
LB: loop body
LE: loop exit
PB: predicated region body
PF: predicated region fallthrough
CT: control target
= control target key end

     0   :  { %8 = vsyncpa [#allocation6], 0  ;;  %s767_s0 = inlined_call_operand.hbm [shape: f32[4,128], index: 0, kind: input, shape index: {}]   ;;  %s768_s1 = inlined_call_operand.hbm [shape: f32[8,128], index: 1, kind: input, shape index: {}]   ;;  %s769_s2 = inlined_call_operand.hbm [shape: f32[8,128], index: 2, kind: input, shape index: {}]   ;;  %s770_s3 = inlined_call_operand.hbm [shape: f32[4,128], index: 3, kind: output, shape index: {}]  }
   0x1   :  { %9 = vsyncpa [#allocation9], 0 }
   0x2   :  { %10 = vsyncpa [#allocation7], 0  ;;  %s617_s12 = smov [#allocation8]   ;;  %s618_s14 = smov [#allocation5]  }
   0x3   :  { %s27_s13 = sshll.u32 %s617_s12, 4  ;;  %s17_s15 = sshll.u32 %s618_s14, 4  ;;  %s28_s13 = int_to_ptr.vmem [resolvable:$true] %s27_s13  ;;  %s18_s15 = int_to_ptr.vmem [resolvable:$true] %s17_s15 }
   0x4   :  { %s539_s16 = scalar_lea.vmem %s28_s13, 128  ;;  %p544_p1 = scmp.lt.s32.totalorder %s28_s13, %s28_s13 }
   0x5   :  { %p540_p0 = scmp.ne.s32.totalorder %s28_s13, %s539_s16  ;;  %p545_p2 = scmp.lt.s32.totalorder %s539_s16, %s539_s16 }
   0x7   :  { %p546_p3 = por %p545_p2, %p544_p1 }
   0x9   :  { %p547_p4 = pnand %p546_p3, %p540_p0 }
   0xb   :  { %550 = shalt.err (!%p547_p4)
}
   0xc   :  { %30 = dma.hbm_to_vmem [thread:$0]  %s768_s1, 128, %s28_s13, [#allocation9]  }
   0xd   :  { %s559_s19 = scalar_lea.vmem %s18_s15, 64  ;;  %p564_p6 = scmp.lt.s32.totalorder %s18_s15, %s18_s15 }
   0xe   :  { %p560_p5 = scmp.ne.s32.totalorder %s18_s15, %s559_s19  ;;  %p565_p7 = scmp.lt.s32.totalorder %s559_s19, %s559_s19 }
  0x10   :  { %p566_p8 = por %p565_p7, %p564_p6 }
  0x12   :  { %p567_p9 = pnand %p566_p8, %p560_p5 }
  0x14   :  { %570 = shalt.err (!%p567_p9)
}
  0x15   :  { %20 = dma.hbm_to_vmem [thread:$0]  %s767_s0, 64, %s18_s15, [#allocation6]  }
  0x16   :  { %s619_s22 = smov [#allocation10]  }
  0x17   :  { %s37_s23 = sshll.u32 %s619_s22, 4  ;;  %s38_s23 = int_to_ptr.vmem [resolvable:$true] %s37_s23 }
  0x18   :  { %s579_s24 = scalar_lea.vmem %s38_s23, 128  ;;  %p584_p11 = scmp.lt.s32.totalorder %s38_s23, %s38_s23 }
  0x19   :  { %p580_p10 = scmp.ne.s32.totalorder %s38_s23, %s579_s24  ;;  %p585_p12 = scmp.lt.s32.totalorder %s579_s24, %s579_s24 }
  0x1b   :  { %p586_p13 = por %p585_p12, %p584_p11 }
  0x1d   :  { %p587_p0 = pnand %p586_p13, %p580_p10 }
  0x1f   :  { %590 = shalt.err (!%p587_p0)
}
  0x20   :  { %40 = dma.hbm_to_vmem [thread:$0]  %s769_s2, 128, %s38_s23, [#allocation9]  }
  0x21   :  { %611 = dma.done.wait [#allocation6], 64  }
  0x22   :  { %612 = vsyncadd [#allocation6], 4294967232 }
  0x23   :  { %613 = dma.done.wait [#allocation9], 256  }
  0x24   :  { %614 = vsyncadd [#allocation9], 4294967040  ;;  %v656_v0 = vld [vmem:[#allocation10] sm:$0xff]  ;;  %v658_v1 = vld [vmem:[#allocation5 + $0x2] sm:$0x1]  ;;  %s626_s0 = smov [#allocation11]  }
  0x25   :  { %v660_v2 = vld [vmem:[#allocation5 + $0x3] sm:$0x1]  ;;  %v51_v3 = vand.u32 2147483647, %v656_v0  ;;  %v54_v4 = vand.u32 2139095040, %v656_v0  ;;  %vm53_vm7 = vcmp.lt.s32.totalorder %v656_v0, 0  ;;  %vm143_vm15 = vweird.f32 %v656_v0 }
  0x26   :  { %172 = vst [vmem:[#allocation3] sm:$0x1] %v658_v1  ;;  %173 = vst [vmem:[#allocation4] sm:$0x1] %v660_v2  ;;  %v178_v5 = vld [vmem:[#allocation8] sm:$0x1] }
  0x27   :  { %v177_v6 = vmul.f32 0.99, %v660_v2  ;;  %v179_v7 = vmul.f32 0.2, %v178_v5  ;;  %v187_v8 = vld [vmem:[#allocation8 + $0x1] sm:$0x1] }
  0x28   :  { %v55_v9 = vshrl.u32 %v54_v4, 23  ;;  %v188_v11 = vmul.f32 0.2, %v187_v8  ;;  %v196_v13 = vld [vmem:[#allocation8 + $0x2] sm:$0x1]  ;;  %s481_s2 = sshll.u32 %s626_s0, 4  ;;  %s482_s2 = int_to_ptr.vmem [resolvable:$true] %s481_s2 }
  0x29   :  { %v667_v10 = vadd.f32 %v179_v7, %v177_v6  ;;  %v58_v14 = vand.u32 8388607, %v51_v3  ;;  %v197_v18 = vmul.f32 0.2, %v196_v13  ;;  %v205_v19 = vld [vmem:[#allocation8 + $0x3] sm:$0x1]  ;;  %p596_p2 = scmp.lt.s32.totalorder %s482_s2, %s482_s2 }
  0x2a   :  { %v491_v12 = vadd.s32 4294967169, %v55_v9  ;;  %v214_v24 = vld [vmem:[#allocation8 + $0x4] sm:$0x1]  ;;  %v206_v27 = vmul.f32 0.2, %v205_v19  ;;  %s591_s26 = scalar_lea.vmem %s482_s2, 64 }
  0x2b   :  { %182 = vst [vmem:[#allocation4 + $0x1] sm:$0x1] %v667_v10  ;;  %v186_v15 = vmul.f32 0.99, %v667_v10  ;;  %v59_v20 = vor.u32 8388608, %v58_v14  ;;  %p592_p1 = scmp.ne.s32.totalorder %s482_s2, %s591_s26  ;;  %p597_p3 = scmp.lt.s32.totalorder %s591_s26, %s591_s26 }
  0x2c   :  { %v61_v16 = vadd.s32 1, %v491_v12  ;;  %v620_v29 = vmov 683565275   ;;  %v621_v31 = vmov 2475754826  }
  0x2d   :  { %v673_v17 = vadd.f32 %v188_v11, %v186_v15  ;;  %v622_v33 = vmov 2131351028   ;;  %v623_v35 = vmov 2102212464   ;;  %v624_v37 = vmov 920167782   ;;  %p598_p4 = por %p597_p3, %p596_p2 }
  0x2e   :  { %vm62_vm0 = vcmp.gt.s32.totalorder %v61_v16, 0  ;;  %v99_v39 = vshll.u32 %v59_v20, 8  ;;  %v215_v40 = vmul.f32 0.2, %v214_v24  ;;  %v625_v46 = vmov 1326507024  }
  0x2f   :  { %v63_v21 = vsel %vm62_vm0, %v61_v16, 0  ;;  %191 = vst [vmem:[#allocation4 + $0x2] sm:$0x1] %v673_v17  ;;  %v195_v22 = vmul.f32 0.99, %v673_v17  ;;  %p599_p5 = pnand %p598_p4, %p592_p1 }
  0x30   :  { %v65_v23 = vand.u32 31, %v63_v21  ;;  %v64_v25 = vshrl.u32 %v63_v21, 5  ;;  %v223_v4 = vld [vmem:[#allocation8 + $0x5] sm:$0x1]  ;;  %v232_v16 = vld [vmem:[#allocation8 + $0x6] sm:$0x1] }
  0x31   :  { %v677_v26 = vadd.f32 %v197_v18, %v195_v22  ;;  %v224_v15 = vmul.f32 0.2, %v223_v4  ;;  %v233_v22 = vmul.f32 0.2, %v232_v16  ;;  %vm52_vm8 = vcmp.le.f32.partialorder %v51_v3, 0.7853982 }
  0x32   :  { %v66_v28 = vsub.s32 32, %v65_v23  ;;  %v68_v30 = vshll.u32 %v620_v29, %v65_v23  ;;  %v71_v32 = vshll.u32 %v621_v31, %v65_v23  ;;  %v74_v34 = vshll.u32 %v622_v33, %v65_v23 }
  0x33   :  { %v77_v36 = vshll.u32 %v623_v35, %v65_v23  ;;  %v80_v38 = vshll.u32 %v624_v37, %v65_v23  ;;  %200 = vst [vmem:[#allocation4 + $0x3] sm:$0x1] %v677_v26  ;;  %vm83_vm1 = vcmp.lt.s32.totalorder %v64_v25, 1  ;;  %vm86_vm2 = vcmp.lt.s32.totalorder %v64_v25, 4 }
  0x34   :  { %v67_v41 = vshrl.u32 %v620_v29, %v66_v28  ;;  %v69_v42 = vshrl.u32 %v621_v31, %v66_v28  ;;  %v72_v43 = vshrl.u32 %v622_v33, %v66_v28  ;;  %v75_v44 = vshrl.u32 %v623_v35, %v66_v28 }
  0x35   :  { %v78_v45 = vshrl.u32 %v624_v37, %v66_v28  ;;  %v81_v47 = vshrl.u32 %v625_v46, %v66_v28  ;;  %v204_v51 = vmul.f32 0.99, %v677_v26  ;;  %vm84_vm3 = vcmp.lt.s32.totalorder %v64_v25, 2 }
  0x36   :  { %v70_v48 = vor.u32 %v69_v42, %v68_v30  ;;  %v73_v49 = vor.u32 %v72_v43, %v71_v32  ;;  %v76_v50 = vor.u32 %v75_v44, %v74_v34  ;;  %vm85_vm4 = vcmp.lt.s32.totalorder %v64_v25, 3 }
  0x37   :  { %v79_v52 = vor.u32 %v78_v45, %v77_v36  ;;  %v82_v53 = vor.u32 %v81_v47, %v80_v38  ;;  %v692_v61 = vadd.f32 %v206_v27, %v204_v51 }
  0x38   :  { %v87_v54 = vsel %vm83_vm1, %v67_v41, %v70_v48  ;;  %v88_v55 = vsel %vm86_vm2, %v76_v50, 2102212464  ;;  %v91_v56 = vsel %vm83_vm1, %v70_v48, %v73_v49  ;;  %v95_v57 = vsel %vm83_vm1, %v73_v49, %v76_v50 }
  0x39   :  { %v89_v58 = vsel %vm85_vm4, %v73_v49, %v88_v55  ;;  %v92_v59 = vsel %vm86_vm2, %v79_v52, 920167782  ;;  %v96_v60 = vsel %vm86_vm2, %v82_v53, 1326507024  ;;  %209 = vst [vmem:[#allocation4 + $0x4] sm:$0x1] %v692_v61 }
  0x3a   :  { %v93_v62 = vsel %vm85_vm4, %v76_v50, %v92_v59  ;;  %v97_v63 = vsel %vm85_vm4, %v79_v52, %v96_v60  ;;  %v90_v5 = vsel %vm84_vm3, %v87_v54, %v89_v58  ;;  %v213_v8 = vmul.f32 0.99, %v692_v61 }
  0x3b   :  { %v94_v6 = vsel %vm84_vm3, %v91_v56, %v93_v62  ;;  %v98_v7 = vsel %vm84_vm3, %v95_v57, %v97_v63  ;;  %v106_v18 = vmul.u32 %v99_v39, %v90_v5 }
  0x3c   :  { %v696_v9 = vmul.u32.u64.low %v99_v39, %v98_v7  ;;  %v697_v11 = vmul.u32.u64.high %v99_v39, %v98_v7, %v696_v9  ;;  %v699_v12 = vmul.u32.u64.low %v99_v39, %v94_v6  ;;  %v700_v13 = vmul.u32.u64.high %v99_v39, %v94_v6, %v699_v12 }
  0x3d   :  { %v702_v14 = vadd.f32 %v215_v40, %v213_v8 }
  0x3e   :  { %vm108_vm5 = vc.u32 %v697_v11, %v699_v12  ;;  %v109_v20 = vadd.s32 1, %v700_v13  ;;  %v107_v41 = vadd.s32 %v699_v12, %v697_v11 }
  0x3f   :  { %218 = vst [vmem:[#allocation4 + $0x5] sm:$0x1] %v702_v14  ;;  %v222_v19 = vmul.f32 0.99, %v702_v14 }
  0x40   :  { %v110_v23 = vsel %vm108_vm5, %v109_v20, %v700_v13 }
  0x41   :  { %v708_v21 = vadd.f32 %v224_v15, %v222_v19  ;;  %v111_v24 = vadd.s32 %v110_v23, %v106_v18 }
  0x43   :  { %227 = vst [vmem:[#allocation4 + $0x6] sm:$0x1] %v708_v21  ;;  %v231_v25 = vmul.f32 0.99, %v708_v21  ;;  %v112_v27 = vadd.s32 536870912, %v111_v24 }
  0x45   :  { %v713_v28 = vadd.f32 %v233_v22, %v231_v25  ;;  %v113_v30 = vshrl.u32 %v112_v27, 30  ;;  %v241_v22 = vld [vmem:[#allocation8 + $0x7] sm:$0x1] }
  0x47   :  { %236 = vst [vmem:[#allocation4 + $0x7] sm:$0x1] %v713_v28  ;;  %v114_v32 = vshll.u32 %v113_v30, 30  ;;  %v137_v57 = vsub.s32 4, %v113_v30  ;;  %v240_v23 = vmul.f32 0.99, %v713_v28 }
  0x49   :  { %v115_v34 = vsub.s32 %v111_v24, %v114_v32  ;;  %v138_v59 = vsel %vm53_vm7, %v137_v57, %v113_v30  ;;  %v242_v24 = vmul.f32 0.2, %v241_v22 }
  0x4a   :  { %v140_v60 = vsel %vm52_vm8, 0, %v138_v59 }
  0x4b   :  { %v117_v36 = vsub.s32 0, %v115_v34  ;;  %v144_v62 = vand.u32 3, %v140_v60  ;;  %v145_v7 = vadd.s32 3, %v140_v60  ;;  %v243_v25 = vadd.f32 %v242_v24, %v240_v23 }
  0x4d   :  { %v492_v38 = vmin.u32 %v117_v36, %v115_v34  ;;  %vm151_vm9 = vcmp.eq.s32.totalorder %v144_v62, 2  ;;  %vm148_vm10 = vcmp.eq.s32.totalorder %v144_v62, 0  ;;  %vm147_vm11 = vcmp.lt.s32.totalorder %v144_v62, 2  ;;  %474 = vst [vmem:[#allocation11 + $0x3] sm:$0x1] %v243_v25 }
  0x4e   :  { %v146_v11 = vand.u32 3, %v145_v7 }
  0x4f   :  { %v119_v39 = vclz %v492_v38 }
  0x50   :  { %vm156_vm12 = vcmp.eq.s32.totalorder %v146_v11, 0  ;;  %vm159_vm13 = vcmp.eq.s32.totalorder %v146_v11, 2  ;;  %vm155_vm14 = vcmp.lt.s32.totalorder %v146_v11, 2 }
  0x51   :  { %v493_v40 = vadd.s32 4294967294, %v119_v39 }
  0x53   :  { %vm494_vm6 = vcmp.lt.s32.totalorder %v493_v40, 0 }
  0x54   :  { %v122_v42 = vsel %vm494_vm6, 0, %v493_v40 }
  0x55   :  { %v123_v43 = vsub.s32 32, %v122_v42  ;;  %v124_v44 = vshll.u32 %v115_v34, %v122_v42  ;;  %v127_v45 = vsub.s32 4294967266, %v122_v42 }
  0x57   :  { %v125_v47 = vshrl.u32 %v107_v41, %v123_v43  ;;  %v128_v48 = vadd.s32 127, %v127_v45 }
  0x59   :  { %v126_v49 = vor.u32 %v125_v47, %v124_v44  ;;  %v129_v50 = vshll.u32 %v128_v48, 23 }
  0x5b   :  { %v130_v51 = vor.u32 4788187, %v129_v50  ;;  %v133_v52 = vcvt.s32.f32 %v126_v49 }
  0x5d   :  { %v131_v53 = vand.u32 2147483647, %v130_v51 }
  0x5f   :  { %v134_v54 = vmul.f32 %v133_v52, %v131_v53 }
  0x61   :  { %v135_v55 = vxor.u32 2147483648, %v134_v54 }
  0x63   :  { %v136_v56 = vsel %vm53_vm7, %v135_v55, %v134_v54 }
  0x64   :  { %v139_v58 = vsel %vm52_vm8, %v656_v0, %v136_v56 }
  0x65   :  { %521 = vcosq.f32 %v139_v58 }
  0x66   :  { %523 = vsinq.f32 %v139_v58 }
  0x72   :  { %v522_v63 = vpop.eup %521 }
  0x73   :  { %v524_v4 = vpop.eup %523  ;;  %v152_v5 = vxor.u32 2147483648, %v522_v63 }
  0x74   :  { %v149_v6 = vxor.u32 2147483648, %v524_v4 }
  0x75   :  { %v153_v8 = vsel %vm151_vm9, %v152_v5, %v524_v4  ;;  %v161_v13 = vsel %vm159_vm13, %v152_v5, %v524_v4 }
  0x76   :  { %v150_v3 = vsel %vm148_vm10, %v522_v63, %v149_v6  ;;  %v158_v12 = vsel %vm156_vm12, %v522_v63, %v149_v6 }
  0x77   :  { %v154_v9 = vsel %vm147_vm11, %v150_v3, %v153_v8  ;;  %v162_v15 = vsel %vm155_vm14, %v158_v12, %v161_v13 }
  0x78   :  { %525 = vrcp.f32 %v154_v9 }
  0x85   :  { %v526_v16 = vpop.eup %525 }
  0x86   :  { %v164_v18 = vmul.f32 %v526_v16, %v162_v15 }
  0x88   :  { %v165_v19 = vsel %vm143_vm15, nan, %v164_v18 }
  0x89   :  { %v166_v20 = vmul.f32 0.1, %v165_v19 }
  0x8b   :  { %167 = vst [vmem:[#allocation2] sm:$0xff] %v166_v20 }
  0x92   :  { %v174_v27 = vld [vmem:[#allocation2] sm:$0x1]  ;;  %v183_v30 = vld [vmem:[#allocation2 + $0x1] sm:$0x1]  ;;  %v192_v34 = vld [vmem:[#allocation2 + $0x2] sm:$0x1] }
  0x93   :  { %v175_v32 = vmul.f32 %v174_v27, %v660_v2  ;;  %v184_v38 = vmul.f32 %v183_v30, %v667_v10  ;;  %v201_v0 = vld [vmem:[#allocation2 + $0x3] sm:$0x1]  ;;  %v193_v40 = vmul.f32 %v192_v34, %v673_v17  ;;  %v210_v41 = vld [vmem:[#allocation2 + $0x4] sm:$0x1]  ;;  %v219_v44 = vld [vmem:[#allocation2 + $0x5] sm:$0x1] }
  0x94   :  { %v202_v43 = vmul.f32 %v201_v0, %v677_v26  ;;  %v211_v2 = vmul.f32 %v210_v41, %v692_v61  ;;  %v228_v47 = vld [vmem:[#allocation2 + $0x6] sm:$0x1]  ;;  %v220_v10 = vmul.f32 %v219_v44, %v702_v14  ;;  %v237_v48 = vld [vmem:[#allocation2 + $0x7] sm:$0x1] }
  0x95   :  { %v176_v36 = vadd.f32 %v175_v32, %v658_v1  ;;  %v229_v17 = vmul.f32 %v228_v47, %v708_v21  ;;  %v238_v51 = vmul.f32 %v237_v48, %v713_v28 }
  0x97   :  { %181 = vst [vmem:[#allocation3 + $0x1] sm:$0x1] %v176_v36  ;;  %v185_v39 = vadd.f32 %v184_v38, %v176_v36 }
  0x99   :  { %190 = vst [vmem:[#allocation3 + $0x2] sm:$0x1] %v185_v39  ;;  %v194_v42 = vadd.f32 %v193_v40, %v185_v39 }
  0x9b   :  { %199 = vst [vmem:[#allocation3 + $0x3] sm:$0x1] %v194_v42  ;;  %v203_v45 = vadd.f32 %v202_v43, %v194_v42 }
  0x9d   :  { %208 = vst [vmem:[#allocation3 + $0x4] sm:$0x1] %v203_v45  ;;  %v212_v1 = vadd.f32 %v211_v2, %v203_v45 }
  0x9f   :  { %217 = vst [vmem:[#allocation3 + $0x5] sm:$0x1] %v212_v1  ;;  %v221_v49 = vadd.f32 %v220_v10, %v212_v1 }
  0xa1   :  { %226 = vst [vmem:[#allocation3 + $0x6] sm:$0x1] %v221_v49  ;;  %v230_v50 = vadd.f32 %v229_v17, %v221_v49 }
  0xa3   :  { %235 = vst [vmem:[#allocation3 + $0x7] sm:$0x1] %v230_v50  ;;  %v239_v26 = vadd.f32 %v238_v51, %v230_v50 }
  0xa5   :  { %473 = vst [vmem:[#allocation11 + $0x2] sm:$0x1] %v239_v26 }
  0xaa   :  { %v732_v52 = vld [vmem:[#allocation3] sm:$0xff] }
  0xab   :  { %v249_v61 = vand.u32 2139095040, %v732_v52  ;;  %v246_v14 = vand.u32 2147483647, %v732_v52  ;;  %vm248_vm7 = vcmp.lt.s32.totalorder %v732_v52, 0  ;;  %vm338_vm15 = vweird.f32 %v732_v52 }
  0xad   :  { %v250_v53 = vshrl.u32 %v249_v61, 23  ;;  %v253_v21 = vand.u32 8388607, %v246_v14  ;;  %vm247_vm8 = vcmp.le.f32.partialorder %v246_v14, 0.7853982 }
  0xaf   :  { %v495_v54 = vadd.s32 4294967169, %v250_v53  ;;  %v254_v9 = vor.u32 8388608, %v253_v21 }
  0xb1   :  { %v256_v55 = vadd.s32 1, %v495_v54 }
  0xb3   :  { %vm257_vm0 = vcmp.gt.s32.totalorder %v256_v55, 0 }
  0xb4   :  { %v258_v56 = vsel %vm257_vm0, %v256_v55, 0 }
  0xb5   :  { %v260_v57 = vand.u32 31, %v258_v56  ;;  %v259_v28 = vshrl.u32 %v258_v56, 5 }
  0xb7   :  { %v261_v58 = vsub.s32 32, %v260_v57  ;;  %v263_v59 = vshll.u32 %v620_v29, %v260_v57  ;;  %v266_v60 = vshll.u32 %v621_v31, %v260_v57  ;;  %v269_v4 = vshll.u32 %v622_v33, %v260_v57 }
  0xb8   :  { %v272_v6 = vshll.u32 %v623_v35, %v260_v57  ;;  %v275_v8 = vshll.u32 %v624_v37, %v260_v57  ;;  %vm278_vm1 = vcmp.lt.s32.totalorder %v259_v28, 1  ;;  %vm281_vm2 = vcmp.lt.s32.totalorder %v259_v28, 4 }
  0xb9   :  { %v264_v62 = vshrl.u32 %v621_v31, %v261_v58  ;;  %v267_v63 = vshrl.u32 %v622_v33, %v261_v58  ;;  %v270_v5 = vshrl.u32 %v623_v35, %v261_v58  ;;  %v273_v7 = vshrl.u32 %v624_v37, %v261_v58 }
  0xba   :  { %v276_v3 = vshrl.u32 %v625_v46, %v261_v58  ;;  %v262_v19 = vshrl.u32 %v620_v29, %v261_v58  ;;  %vm280_vm3 = vcmp.lt.s32.totalorder %v259_v28, 3  ;;  %vm279_vm4 = vcmp.lt.s32.totalorder %v259_v28, 2 }
  0xbb   :  { %v265_v11 = vor.u32 %v264_v62, %v263_v59  ;;  %v268_v12 = vor.u32 %v267_v63, %v266_v60  ;;  %v271_v13 = vor.u32 %v270_v5, %v269_v4  ;;  %v274_v15 = vor.u32 %v273_v7, %v272_v6 }
  0xbc   :  { %v277_v31 = vor.u32 %v276_v3, %v275_v8  ;;  %v294_v46 = vshll.u32 %v254_v9, 8 }
  0xbd   :  { %v283_v16 = vsel %vm281_vm2, %v271_v13, 2102212464  ;;  %v286_v33 = vsel %vm278_vm1, %v265_v11, %v268_v12  ;;  %v290_v18 = vsel %vm278_vm1, %v268_v12, %v271_v13  ;;  %v287_v35 = vsel %vm281_vm2, %v274_v15, 920167782 }
  0xbe   :  { %v291_v20 = vsel %vm281_vm2, %v277_v31, 1326507024  ;;  %v288_v37 = vsel %vm280_vm3, %v271_v13, %v287_v35  ;;  %v282_v23 = vsel %vm278_vm1, %v262_v19, %v265_v11  ;;  %v284_v24 = vsel %vm280_vm3, %v268_v12, %v283_v16  ;;  %v245_v11 = vld [vmem:[#allocation4] sm:$0xff] }
  0xbf   :  { %v292_v22 = vsel %vm280_vm3, %v274_v15, %v291_v20  ;;  %v289_v25 = vsel %vm279_vm4, %v286_v33, %v288_v37  ;;  %v285_v38 = vsel %vm279_vm4, %v282_v23, %v284_v24 }
  0xc0   :  { %v293_v27 = vsel %vm279_vm4, %v290_v18, %v292_v22  ;;  %v752_v34 = vmul.u32.u64.low %v294_v46, %v289_v25  ;;  %v753_v36 = vmul.u32.u64.high %v294_v46, %v289_v25, %v752_v34  ;;  %v301_v0 = vmul.u32 %v294_v46, %v285_v38 }
  0xc1   :  { %v749_v30 = vmul.u32.u64.low %v294_v46, %v293_v27  ;;  %v750_v32 = vmul.u32.u64.high %v294_v46, %v293_v27, %v749_v30 }
  0xc2   :  { %v304_v29 = vadd.s32 1, %v753_v36 }
  0xc3   :  { %vm303_vm5 = vc.u32 %v750_v32, %v752_v34  ;;  %v302_v48 = vadd.s32 %v752_v34, %v750_v32 }
  0xc4   :  { %v305_v39 = vsel %vm303_vm5, %v304_v29, %v753_v36  ;;  %v168_v36 = vld [vmem:[#allocation5] sm:$0x1] }
  0xc5   :  { %v306_v40 = vadd.s32 %v305_v39, %v301_v0 }
  0xc7   :  { %v307_v41 = vadd.s32 536870912, %v306_v40 }
  0xc9   :  { %v308_v42 = vshrl.u32 %v307_v41, 30 }
  0xcb   :  { %v309_v43 = vshll.u32 %v308_v42, 30  ;;  %v332_v58 = vsub.s32 4, %v308_v42 }
  0xcd   :  { %v310_v44 = vsub.s32 %v306_v40, %v309_v43  ;;  %v333_v60 = vsel %vm248_vm7, %v332_v58, %v308_v42 }
  0xce   :  { %v335_v62 = vsel %vm247_vm8, 0, %v333_v60 }
  0xcf   :  { %v312_v45 = vsub.s32 0, %v310_v44  ;;  %v451_v63 = vadd.s32 3, %v335_v62  ;;  %v339_v4 = vand.u32 3, %v335_v62 }
  0xd1   :  { %v496_v2 = vmin.u32 %v312_v45, %v310_v44  ;;  %v452_v5 = vand.u32 3, %v451_v63  ;;  %vm344_vm9 = vcmp.eq.s32.totalorder %v339_v4, 2  ;;  %vm341_vm11 = vcmp.eq.s32.totalorder %v339_v4, 0 }
  0xd2   :  { %vm340_vm13 = vcmp.lt.s32.totalorder %v339_v4, 2 }
  0xd3   :  { %v314_v47 = vclz %v496_v2  ;;  %vm457_vm10 = vcmp.eq.s32.totalorder %v452_v5, 2  ;;  %vm454_vm12 = vcmp.eq.s32.totalorder %v452_v5, 0  ;;  %vm453_vm14 = vcmp.lt.s32.totalorder %v452_v5, 2 }
  0xd5   :  { %v497_v1 = vadd.s32 4294967294, %v314_v47 }
  0xd7   :  { %vm498_vm6 = vcmp.lt.s32.totalorder %v497_v1, 0 }
  0xd8   :  { %v317_v10 = vsel %vm498_vm6, 0, %v497_v1 }
  0xd9   :  { %v318_v49 = vsub.s32 32, %v317_v10  ;;  %v322_v17 = vsub.s32 4294967266, %v317_v10  ;;  %v319_v50 = vshll.u32 %v310_v44, %v317_v10 }
  0xdb   :  { %v320_v51 = vshrl.u32 %v302_v48, %v318_v49  ;;  %v323_v26 = vadd.s32 127, %v322_v17 }
  0xdd   :  { %v321_v61 = vor.u32 %v320_v51, %v319_v50  ;;  %v324_v53 = vshll.u32 %v323_v26, 23 }
  0xdf   :  { %v325_v54 = vor.u32 4788187, %v324_v53  ;;  %v328_v56 = vcvt.s32.f32 %v321_v61 }
  0xe1   :  { %v326_v55 = vand.u32 2147483647, %v325_v54 }
  0xe3   :  { %v329_v57 = vmul.f32 %v328_v56, %v326_v55 }
  0xe5   :  { %v330_v21 = vxor.u32 2147483648, %v329_v57 }
  0xe7   :  { %v331_v28 = vsel %vm248_vm7, %v330_v21, %v329_v57 }
  0xe8   :  { %v334_v59 = vsel %vm247_vm8, %v732_v52, %v331_v28  ;;  %v169_v52 = vld [vmem:[#allocation5 + $0x1] sm:$0x1] }
  0xe9   :  { %527 = vcosq.f32 %v334_v59 }
  0xea   :  { %529 = vsinq.f32 %v334_v59 }
  0xf6   :  { %v528_v6 = vpop.eup %527 }
  0xf7   :  { %v530_v7 = vpop.eup %529  ;;  %v345_v8 = vxor.u32 2147483648, %v528_v6 }
  0xf8   :  { %v342_v3 = vxor.u32 2147483648, %v530_v7 }
  0xf9   :  { %v346_v9 = vsel %vm344_vm9, %v345_v8, %v530_v7  ;;  %v459_v14 = vsel %vm457_vm10, %v345_v8, %v530_v7 }
  0xfa   :  { %v343_v12 = vsel %vm341_vm11, %v528_v6, %v342_v3  ;;  %v456_v13 = vsel %vm454_vm12, %v528_v6, %v342_v3 }
  0xfb   :  { %v347_v15 = vsel %vm340_vm13, %v343_v12, %v346_v9  ;;  %v460_v31 = vsel %vm453_vm14, %v456_v13, %v459_v14 }
  0xfc   :  { %v348_v16 = vsel %vm338_vm15, nan, %v347_v15  ;;  %v461_v33 = vsel %vm338_vm15, nan, %v460_v31 }
  0xfd   :  { %v349_v18 = vmul.f32 %v348_v16, %v245_v11  ;;  %v462_v19 = vmul.f32 %v461_v33, %v245_v11 }
  0xff   :  { %v350_v35 = vrot.slane %v349_v18, 4  ;;  %v463_v20 = vrot.slane %v462_v19, 4 }
 0x101   :  { %v351_v37 = vadd.f32 %v350_v35, %v349_v18  ;;  %v464_v22 = vadd.f32 %v463_v20, %v462_v19 }
 0x103   :  { %v352_v46 = vrot.slane %v351_v37, 2  ;;  %v465_v23 = vrot.slane %v464_v22, 2 }
 0x105   :  { %v353_v24 = vadd.f32 %v352_v46, %v351_v37  ;;  %v466_v25 = vadd.f32 %v465_v23, %v464_v22 }
 0x107   :  { %v354_v27 = vrot.slane %v353_v24, 1  ;;  %v467_v30 = vrot.slane %v466_v25, 1 }
 0x109   :  { %v355_v32 = vadd.f32 %v354_v27, %v353_v24  ;;  %v468_v34 = vadd.f32 %v467_v30, %v466_v25 }
 0x10b   :  { %v356_v38 = vmul.f32 0.2, %v355_v32  ;;  %v469_v29 = vmul.f32 0.2, %v468_v34 }
 0x10d   :  { %v357_v0 = vadd.f32 %v356_v38, %v168_v36  ;;  %v470_v39 = vadd.f32 %v469_v29, %v169_v52 }
 0x10f   :  { %471 = vst [vmem:[#allocation11] sm:$0x1] %v357_v0  ;;  %472 = vst [vmem:[#allocation11 + $0x1] sm:$0x1] %v470_v39 }
 0x110   :  { %602 = shalt.err (!%p599_p5)
}
 0x111   :  { %484 = dma.vmem_to_hbm [thread:$0]  %s482_s2, 64, %s770_s3, [#allocation7]  }
 0x112   :  { %615 = dma.done.wait [#allocation7], 64  }
 0x113   :  { %616 = vsyncadd [#allocation7], 4294967232 }
 0x114   :  { %488 = vsyncpa [#allocation6], 1 }
 0x115   :  { %489 = vsyncpa [#allocation9], 1 }
 0x116   :  { %490 = vsyncpa [#allocation7], 1 }

</bundles_post_ra>
